<compile_context>
chip_gen: v5e
topology: v5e:2x2
jax: 0.10.0
libtpu: 0.0.40
codegen_flags: <defaults>
</compile_context>

<pallas_src>
import numpy as np
import jax
import jax.numpy as jnp
from jax import lax
from jax.experimental import pallas as pl
from jax.experimental.pallas import tpu as pltpu


# -----------------------------------------------------------------------------
# helpers
# -----------------------------------------------------------------------------
def _pick_tile(n, target):
    """Largest multiple-of-8 divisor of n that is <= target; else n (one tile)."""
    if n <= target:
        return n
    t = target - (target % 8)
    while t >= 8:
        if n % t == 0:
            return t
        t -= 8
    return n


# -----------------------------------------------------------------------------
# Kernel 1: row-tiled 2-layer MLP (graph branch, CLS-node features only)
# -----------------------------------------------------------------------------
def _mlp_kernel(x_ref, w1_ref, b1_ref, w2_ref, b2_ref, o_ref):
    x = x_ref[...].astype(jnp.bfloat16)
    h = jnp.dot(x, w1_ref[...], preferred_element_type=jnp.float32) + b1_ref[...]
    h = jnp.maximum(h, 0.0).astype(jnp.bfloat16)
    o = jnp.dot(h, w2_ref[...], preferred_element_type=jnp.float32) + b2_ref[...]
    o_ref[...] = o.astype(o_ref.dtype)


def mlp_pallas(x, w1, b1, w2, b2, *, row_tile=512):
    """x: (M, K) -> (M, Dout); weights resident, rows tiled & parallel."""
    M, K = x.shape
    Dh = w1.shape[1]
    Dout = w2.shape[1]
    tm = _pick_tile(M, row_tile)
    grid = (M // tm,)
    return pl.pallas_call(
        _mlp_kernel,
        out_shape=jax.ShapeDtypeStruct((M, Dout), jnp.float32),
        grid_spec=pltpu.PrefetchScalarGridSpec(
            num_scalar_prefetch=0,
            grid=grid,
            in_specs=[
                pl.BlockSpec((tm, K), lambda i: (i, 0)),
                pl.BlockSpec((K, Dh), lambda i: (0, 0)),
                pl.BlockSpec((1, Dh), lambda i: (0, 0)),
                pl.BlockSpec((Dh, Dout), lambda i: (0, 0)),
                pl.BlockSpec((1, Dout), lambda i: (0, 0)),
            ],
            out_specs=pl.BlockSpec((tm, Dout), lambda i: (i, 0)),
        ),
        compiler_params=pltpu.CompilerParams(
            dimension_semantics=("parallel",)),
    )(x, w1, b1, w2, b2)


# -----------------------------------------------------------------------------
# Kernel 2: fused reagent branch
#   CLS-token MLP  +  masked mean-pool over reagents  +  agg projection
# -----------------------------------------------------------------------------
def _reagent_kernel(emb_ref, cnt_ref, w1_ref, b1_ref, w2_ref, b2_ref,
                    aw_ref, ab_ref, cls_ref, agg_ref):
    tb = cnt_ref.shape[0]          # batch rows in this tile
    rows = emb_ref.shape[0]        # = tb * R
    R = rows // tb

    # 2-layer MLP on the CLS-token embeddings (bf16 MXU, f32 accumulate).
    x = emb_ref[...].astype(jnp.bfloat16)
    h = jnp.dot(x, w1_ref[...], preferred_element_type=jnp.float32) + b1_ref[...]
    h = jnp.maximum(h, 0.0).astype(jnp.bfloat16)
    cls = jnp.dot(h, w2_ref[...], preferred_element_type=jnp.float32) + b2_ref[...]
    cls_ref[...] = cls.astype(cls_ref.dtype)

    # Fused agg_encoder: masked mean over the R reagents of each example,
    # expressed as a (tb, tb*R) selection matmul (no in-kernel reshape, no
    # HBM mask tensor), followed by a linear projection.
    cnt = cnt_ref[...]                                       # (tb, 1) int32
    row = lax.broadcasted_iota(jnp.int32, (tb, rows), 0)
    col = lax.broadcasted_iota(jnp.int32, (tb, rows), 1)
    r_in = col - row * R                                     # reagent idx if owned
    valid = (r_in >= 0) & (r_in < R) & (r_in < cnt)
    sel = valid.astype(jnp.float32)
    pooled = jnp.dot(sel, cls, preferred_element_type=jnp.float32)   # (tb, H)
    # reagent_num == 0 rows give a zero pool; they are masked out downstream.
    denom = jnp.maximum(cnt.astype(jnp.float32), 1.0)
    pooled = pooled * pl.reciprocal(denom, approx=False)
    agg = jnp.dot(pooled.astype(jnp.bfloat16), aw_ref[...],
                  preferred_element_type=jnp.float32) + ab_ref[...]
    agg_ref[...] = agg.astype(agg_ref.dtype)


def reagent_pallas(cls_emb, counts, w1, b1, w2, b2, aw, ab, *, R, row_tile=512):
    """cls_emb: (B*R, H), counts: (B, 1) int32 -> ((B*R, H) CLS enc, (B, H) agg)."""
    BR, H = cls_emb.shape
    B = BR // R
    Dout = aw.shape[1]
    tb = _pick_tile(B, max(8, row_tile // max(R, 1)))
    grid = (B // tb,)
    return pl.pallas_call(
        _reagent_kernel,
        out_shape=(jax.ShapeDtypeStruct((BR, H), jnp.float32),
                   jax.ShapeDtypeStruct((B, Dout), jnp.float32)),
        grid_spec=pltpu.PrefetchScalarGridSpec(
            num_scalar_prefetch=0,
            grid=grid,
            in_specs=[
                pl.BlockSpec((tb * R, H), lambda i: (i, 0)),
                pl.BlockSpec((tb, 1), lambda i: (i, 0)),
                pl.BlockSpec((H, H), lambda i: (0, 0)),
                pl.BlockSpec((1, H), lambda i: (0, 0)),
                pl.BlockSpec((H, H), lambda i: (0, 0)),
                pl.BlockSpec((1, H), lambda i: (0, 0)),
                pl.BlockSpec((H, Dout), lambda i: (0, 0)),
                pl.BlockSpec((1, Dout), lambda i: (0, 0)),
            ],
            out_specs=[
                pl.BlockSpec((tb * R, H), lambda i: (i, 0)),
                pl.BlockSpec((tb, Dout), lambda i: (i, 0)),
            ],
        ),
        compiler_params=pltpu.CompilerParams(
            dimension_semantics=("parallel",)),
    )(cls_emb, counts, w1, b1, w2, b2, aw, ab)


# -----------------------------------------------------------------------------
# Parameter construction (deterministic, synthetic; weights bf16, biases f32)
# -----------------------------------------------------------------------------
def make_params(key, vocab, seq_len, hidden, node_feat):
    ks = jax.random.split(key, 8)
    scale = 0.02

    def w(k, shape):
        return (scale * jax.random.normal(k, shape, jnp.float32)).astype(jnp.bfloat16)

    return {
        # Pos_embeddings + utter_encoder (reagent_model)
        "tok_embed": scale * jax.random.normal(ks[0], (vocab, hidden), jnp.float32),
        "pos_embed": scale * jax.random.normal(ks[1], (seq_len, hidden), jnp.float32),
        "utt_w1": w(ks[2], (hidden, hidden)),
        "utt_b1": jnp.zeros((1, hidden), jnp.float32),
        "utt_w2": w(ks[3], (hidden, hidden)),
        "utt_b2": jnp.zeros((1, hidden), jnp.float32),
        # graph_encoder (react_graph_model)
        "g_w1": w(ks[4], (node_feat, hidden)),
        "g_b1": jnp.zeros((1, hidden), jnp.float32),
        "g_w2": w(ks[5], (hidden, hidden)),
        "g_b2": jnp.zeros((1, hidden), jnp.float32),
        # agg_encoder (reagent_encoder)
        "agg_w": w(ks[6], (hidden, hidden)),
        "agg_b": jnp.zeros((1, hidden), jnp.float32),
    }


# -----------------------------------------------------------------------------
# Target_encoder forward (JAX glue around the Pallas hot paths)
# -----------------------------------------------------------------------------
def target_encoder_forward(params, graphs, graph_num, reagents, reagent_num):
    """
    graphs:      (G_total, N, Fin) float32 node features (node 0 is "CLS")
    graph_num:   python list, per-example number of graphs (sum == G_total)
    reagents:    (B, R_max, L) int32 token ids
    reagent_num: python list, per-example number of valid reagents
    Returns (target_encoding (B, H), output: list of (graph_num[i]+reagent_num[i], H))
    """
    graph_num = list(graph_num)
    reagent_num = list(reagent_num)
    hidden = params["tok_embed"].shape[1]

    bs = reagents.shape[0] if sum(reagent_num) > 0 else len(graph_num)
    assert len(graph_num) == bs and len(reagent_num) == bs

    for i in range(bs):
        if graph_num[i] == 0 and reagent_num[i] == 0:
            raise ValueError("graph_num and reagent_num cannot be both 0")

    utter_cls = None          # (B, R, H) per-reagent CLS encodings
    reagent_encoding = None   # (B, H) pooled+projected reagent encoding
    graph_cls = None          # (G_total, H) per-graph CLS encodings

    # ---- reagent branch -----------------------------------------------------
    if sum(reagent_num) > 0:
        _, R, _L = reagents.shape
        # Only position-0 (CLS) encodings are consumed downstream, so gather
        # only those token embeddings and run the MLP on B*R rows, not B*R*L.
        # TODO(synk): exact only for the synthesized per-token utter_encoder.
        cls_ids = reagents[:, :, 0].reshape(bs * R)
        cls_emb = jnp.take(params["tok_embed"], cls_ids, axis=0)
        cls_emb = cls_emb + params["pos_embed"][0][None, :]
        counts = jnp.asarray(reagent_num, jnp.int32).reshape(bs, 1)
        cls_flat, reagent_encoding = reagent_pallas(
            cls_emb, counts,
            params["utt_w1"], params["utt_b1"],
            params["utt_w2"], params["utt_b2"],
            params["agg_w"], params["agg_b"], R=R)
        utter_cls = cls_flat.reshape(bs, R, hidden)

    # ---- graph branch -------------------------------------------------------
    if sum(graph_num) > 0:
        _g_total, _n_nodes, node_feat = graphs.shape
        # Only node 0 of each graph is consumed downstream.
        # TODO(synk): exact only for the synthesized per-node graph_encoder.
        x0 = graphs[:, 0, :]
        kp = ((node_feat + 127) // 128) * 128       # lane-dense contraction dim
        w1 = params["g_w1"]
        if kp != node_feat:
            x0 = jnp.pad(x0, ((0, 0), (0, kp - node_feat)))
            w1 = jnp.pad(w1, ((0, kp - node_feat), (0, 0)))
        graph_cls = mlp_pallas(x0, w1, params["g_b1"],
                               params["g_w2"], params["g_b2"])

    # ---- combine (vectorized) -----------------------------------------------
    gnum = np.asarray(graph_num, np.int64)
    rnum = np.asarray(reagent_num, np.int64)
    target_encoding = jnp.zeros((bs, hidden), jnp.float32)
    if graph_cls is not None:
        seg_ids = jnp.asarray(np.repeat(np.arange(bs), gnum), jnp.int32)
        graph_sum = jax.ops.segment_sum(graph_cls, seg_ids, num_segments=bs)
        target_encoding = target_encoding + graph_sum            # zero where no graphs
    if reagent_encoding is not None:
        use_r = jnp.asarray((rnum > 0).astype(np.float32))[:, None]
        target_encoding = target_encoding + reagent_encoding * use_r

    # ---- per-example ragged output list (ragged by the module contract) -----
    output = []
    goff = np.concatenate([[0], np.cumsum(gnum)])
    for i in range(bs):
        parts = []
        if graph_cls is not None and graph_num[i] > 0:
            parts.append(graph_cls[int(goff[i]):int(goff[i + 1])])
        if utter_cls is not None and reagent_num[i] > 0:
            parts.append(utter_cls[i, :reagent_num[i], :])
        output.append(parts[0] if len(parts) == 1
                      else jnp.concatenate(parts, axis=0))
    return target_encoding, output


# -----------------------------------------------------------------------------
if __name__ == "__main__":
    key = jax.random.PRNGKey(0)
    kp, kr, kg = jax.random.split(key, 3)

    # small, module-consistent shapes
    bs = 2
    reactant_num_max = 4
    reactant_len = 8
    vocab = 64
    hidden = 128
    n_nodes = 8
    node_feat = 16
    graph_num = [2, 1]          # total graphs = 3
    reagent_num = [2, 3]
    g_total = sum(graph_num)

    params = make_params(kp, vocab, reactant_len, hidden, node_feat)

    reagents = jax.random.randint(kr, (bs, reactant_num_max, reactant_len),
                                  0, vocab, dtype=jnp.int32)
    graphs = jax.random.normal(kg, (g_total, n_nodes, node_feat), jnp.float32)

    target_encoding, output = target_encoder_forward(
        params, graphs, graph_num, reagents, reagent_num)

    jax.block_until_ready(target_encoding)
    for o in output:
        jax.block_until_ready(o)

    assert target_encoding.shape == (bs, hidden)
    for i in range(bs):
        assert output[i].shape == (graph_num[i] + reagent_num[i], hidden)

    print("KERNEL_OK")
</pallas_src>

<mosaic_0001>
module attributes {stable_mosaic.version = 11 : i64} {
  func.func @_reagent_kernel(%arg0: i32, %arg1: memref<8x128xf32, #tpu.memory_space<vmem>>, %arg2: memref<2x1xi32, #tpu.memory_space<vmem>>, %arg3: memref<128x128xbf16, #tpu.memory_space<vmem>>, %arg4: memref<1x128xf32, #tpu.memory_space<vmem>>, %arg5: memref<128x128xbf16, #tpu.memory_space<vmem>>, %arg6: memref<1x128xf32, #tpu.memory_space<vmem>>, %arg7: memref<128x128xbf16, #tpu.memory_space<vmem>>, %arg8: memref<1x128xf32, #tpu.memory_space<vmem>>, %arg9: memref<8x128xf32, #tpu.memory_space<vmem>>, %arg10: memref<2x128xf32, #tpu.memory_space<vmem>>) attributes {dimension_semantics = [#tpu.dimension_semantics<parallel>], iteration_bounds = array<i64: 1>, scalar_prefetch = 0 : i64, scratch_operands = 0 : i64, tpu.core_type = #tpu.core_type<tc>, window_params = [{transform_indices = @transform_0, window_bounds = array<i64: 8, 128>}, {transform_indices = @transform_1, window_bounds = array<i64: 2, 1>}, {pipeline_mode = #tpu.pipeline_mode<synchronous>, transform_indices = @transform_2, window_bounds = array<i64: 128, 128>}, {pipeline_mode = #tpu.pipeline_mode<synchronous>, transform_indices = @transform_3, window_bounds = array<i64: 1, 128>}, {pipeline_mode = #tpu.pipeline_mode<synchronous>, transform_indices = @transform_4, window_bounds = array<i64: 128, 128>}, {pipeline_mode = #tpu.pipeline_mode<synchronous>, transform_indices = @transform_5, window_bounds = array<i64: 1, 128>}, {pipeline_mode = #tpu.pipeline_mode<synchronous>, transform_indices = @transform_6, window_bounds = array<i64: 128, 128>}, {pipeline_mode = #tpu.pipeline_mode<synchronous>, transform_indices = @transform_7, window_bounds = array<i64: 1, 128>}, {transform_indices = @transform_8, window_bounds = array<i64: 8, 128>}, {transform_indices = @transform_9, window_bounds = array<i64: 2, 128>}]} {
    %c0 = arith.constant 0 : index
    %c0_0 = arith.constant 0 : index
    %0 = vector.load %arg1[%c0, %c0_0] : memref<8x128xf32, #tpu.memory_space<vmem>>, vector<8x128xf32>
    %1 = arith.truncf %0 : vector<8x128xf32> to vector<8x128xbf16>
    %c0_1 = arith.constant 0 : index
    %c0_2 = arith.constant 0 : index
    %2 = vector.load %arg3[%c0_1, %c0_2] : memref<128x128xbf16, #tpu.memory_space<vmem>>, vector<128x128xbf16>
    %cst = arith.constant dense<0.000000e+00> : vector<8x128xf32>
    %3 = tpu.matmul %1, %2, %cst {dimension_numbers = #tpu.dot_dimension_numbers<[1], [0], [0], [1], [0, 0, 1, 1], [], []>} : vector<8x128xbf16>, vector<128x128xbf16>, vector<8x128xf32> -> vector<8x128xf32>
    %c0_3 = arith.constant 0 : index
    %c0_4 = arith.constant 0 : index
    %4 = vector.load %arg4[%c0_3, %c0_4] : memref<1x128xf32, #tpu.memory_space<vmem>>, vector<1x128xf32>
    %5 = vector.broadcast %4 : vector<1x128xf32> to vector<8x128xf32>
    %6 = arith.addf %3, %5 : vector<8x128xf32>
    %cst_5 = arith.constant 0.000000e+00 : f32
    %7 = vector.broadcast %cst_5 : f32 to vector<8x128xf32>
    %8 = arith.maximumf %6, %7 : vector<8x128xf32>
    %9 = arith.truncf %8 : vector<8x128xf32> to vector<8x128xbf16>
    %c0_6 = arith.constant 0 : index
    %c0_7 = arith.constant 0 : index
    %10 = vector.load %arg5[%c0_6, %c0_7] : memref<128x128xbf16, #tpu.memory_space<vmem>>, vector<128x128xbf16>
    %cst_8 = arith.constant dense<0.000000e+00> : vector<8x128xf32>
    %11 = tpu.matmul %9, %10, %cst_8 {dimension_numbers = #tpu.dot_dimension_numbers<[1], [0], [0], [1], [0, 0, 1, 1], [], []>} : vector<8x128xbf16>, vector<128x128xbf16>, vector<8x128xf32> -> vector<8x128xf32>
    %c0_9 = arith.constant 0 : index
    %c0_10 = arith.constant 0 : index
    %12 = vector.load %arg6[%c0_9, %c0_10] : memref<1x128xf32, #tpu.memory_space<vmem>>, vector<1x128xf32>
    %13 = vector.broadcast %12 : vector<1x128xf32> to vector<8x128xf32>
    %14 = arith.addf %11, %13 : vector<8x128xf32>
    %c0_11 = arith.constant 0 : index
    %c0_12 = arith.constant 0 : index
    %15 = vector.load %arg9[%c0_11, %c0_12] : memref<8x128xf32, #tpu.memory_space<vmem>>, vector<8x128xf32>
    tpu.vector_store %arg9[%c0_11, %c0_12], %14 {strides = array<i32>} : memref<8x128xf32, #tpu.memory_space<vmem>>, vector<8x128xf32>,
    %c0_13 = arith.constant 0 : index
    %c0_14 = arith.constant 0 : index
    %16 = vector.load %arg2[%c0_13, %c0_14] : memref<2x1xi32, #tpu.memory_space<vmem>>, vector<2x1xi32>
    %17 = tpu.iota {dimensions = array<i32: 0>} : vector<2x8xi32>
    %18 = tpu.iota {dimensions = array<i32: 1>} : vector<2x8xi32>
    %c4_i32 = arith.constant 4 : i32
    %19 = vector.broadcast %c4_i32 : i32 to vector<2x8xi32>
    %20 = arith.muli %17, %19 : vector<2x8xi32>
    %21 = arith.subi %18, %20 : vector<2x8xi32>
    %c0_i32 = arith.constant 0 : i32
    %22 = vector.broadcast %c0_i32 : i32 to vector<2x8xi32>
    %23 = arith.cmpi sge, %21, %22 : vector<2x8xi32>
    %c4_i32_15 = arith.constant 4 : i32
    %24 = vector.broadcast %c4_i32_15 : i32 to vector<2x8xi32>
    %25 = arith.cmpi slt, %21, %24 : vector<2x8xi32>
    %26 = arith.andi %23, %25 : vector<2x8xi1>
    %27 = vector.broadcast %16 : vector<2x1xi32> to vector<2x8xi32>
    %28 = arith.cmpi slt, %21, %27 : vector<2x8xi32>
    %29 = arith.andi %26, %28 : vector<2x8xi1>
    %30 = arith.extui %29 : vector<2x8xi1> to vector<2x8xi32>
    %31 = arith.sitofp %30 : vector<2x8xi32> to vector<2x8xf32>
    %cst_16 = arith.constant dense<0.000000e+00> : vector<2x128xf32>
    %32 = tpu.matmul %31, %14, %cst_16 {dimension_numbers = #tpu.dot_dimension_numbers<[1], [0], [0], [1], [0, 0, 1, 1], [], []>} : vector<2x8xf32>, vector<8x128xf32>, vector<2x128xf32> -> vector<2x128xf32>
    %33 = arith.sitofp %16 : vector<2x1xi32> to vector<2x1xf32>
    %cst_17 = arith.constant 1.000000e+00 : f32
    %34 = vector.broadcast %cst_17 : f32 to vector<2x1xf32>
    %35 = arith.maximumf %33, %34 : vector<2x1xf32>
    %36 = tpu.reciprocal %35 : vector<2x1xf32> -> vector<2x1xf32>
    %37 = vector.broadcast %36 : vector<2x1xf32> to vector<2x128xf32>
    %38 = arith.mulf %32, %37 : vector<2x128xf32>
    %39 = arith.truncf %38 : vector<2x128xf32> to vector<2x128xbf16>
    %c0_18 = arith.constant 0 : index
    %c0_19 = arith.constant 0 : index
    %40 = vector.load %arg7[%c0_18, %c0_19] : memref<128x128xbf16, #tpu.memory_space<vmem>>, vector<128x128xbf16>
    %cst_20 = arith.constant dense<0.000000e+00> : vector<2x128xf32>
    %41 = tpu.matmul %39, %40, %cst_20 {dimension_numbers = #tpu.dot_dimension_numbers<[1], [0], [0], [1], [0, 0, 1, 1], [], []>} : vector<2x128xbf16>, vector<128x128xbf16>, vector<2x128xf32> -> vector<2x128xf32>
    %c0_21 = arith.constant 0 : index
    %c0_22 = arith.constant 0 : index
    %42 = vector.load %arg8[%c0_21, %c0_22] : memref<1x128xf32, #tpu.memory_space<vmem>>, vector<1x128xf32>
    %43 = vector.broadcast %42 : vector<1x128xf32> to vector<2x128xf32>
    %44 = arith.addf %41, %43 : vector<2x128xf32>
    %c0_23 = arith.constant 0 : index
    %c0_24 = arith.constant 0 : index
    %45 = vector.load %arg10[%c0_23, %c0_24] : memref<2x128xf32, #tpu.memory_space<vmem>>, vector<2x128xf32>
    tpu.vector_store %arg10[%c0_23, %c0_24], %44 {strides = array<i32>} : memref<2x128xf32, #tpu.memory_space<vmem>>, vector<2x128xf32>,
    return
  }
  func.func @transform_0(%arg0: i32) -> (i32, i32) {
    %c0_i32 = arith.constant 0 : i32
    %c0_i32_0 = arith.constant 0 : i32
    return %arg0, %c0_i32 : i32, i32
  }
  func.func @transform_1(%arg0: i32) -> (i32, i32) {
    %c0_i32 = arith.constant 0 : i32
    %c0_i32_0 = arith.constant 0 : i32
    return %arg0, %c0_i32 : i32, i32
  }
  func.func @transform_2(%arg0: i32) -> (i32, i32) {
    %c0_i32 = arith.constant 0 : i32
    %c0_i32_0 = arith.constant 0 : i32
    %c0_i32_1 = arith.constant 0 : i32
    return %c0_i32, %c0_i32_0 : i32, i32
  }
  func.func @transform_3(%arg0: i32) -> (i32, i32) {
    %c0_i32 = arith.constant 0 : i32
    %c0_i32_0 = arith.constant 0 : i32
    %c0_i32_1 = arith.constant 0 : i32
    return %c0_i32, %c0_i32_0 : i32, i32
  }
  func.func @transform_4(%arg0: i32) -> (i32, i32) {
    %c0_i32 = arith.constant 0 : i32
    %c0_i32_0 = arith.constant 0 : i32
    %c0_i32_1 = arith.constant 0 : i32
    return %c0_i32, %c0_i32_0 : i32, i32
  }
  func.func @transform_5(%arg0: i32) -> (i32, i32) {
    %c0_i32 = arith.constant 0 : i32
    %c0_i32_0 = arith.constant 0 : i32
    %c0_i32_1 = arith.constant 0 : i32
    return %c0_i32, %c0_i32_0 : i32, i32
  }
  func.func @transform_6(%arg0: i32) -> (i32, i32) {
    %c0_i32 = arith.constant 0 : i32
    %c0_i32_0 = arith.constant 0 : i32
    %c0_i32_1 = arith.constant 0 : i32
    return %c0_i32, %c0_i32_0 : i32, i32
  }
  func.func @transform_7(%arg0: i32) -> (i32, i32) {
    %c0_i32 = arith.constant 0 : i32
    %c0_i32_0 = arith.constant 0 : i32
    %c0_i32_1 = arith.constant 0 : i32
    return %c0_i32, %c0_i32_0 : i32, i32
  }
  func.func @transform_8(%arg0: i32) -> (i32, i32) {
    %c0_i32 = arith.constant 0 : i32
    %c0_i32_0 = arith.constant 0 : i32
    return %arg0, %c0_i32 : i32, i32
  }
  func.func @transform_9(%arg0: i32) -> (i32, i32) {
    %c0_i32 = arith.constant 0 : i32
    %c0_i32_0 = arith.constant 0 : i32
    return %arg0, %c0_i32 : i32, i32
  }
}

</mosaic_0001>

<bundles_post_ra>
// kernel: tpu_custom_call.1
= control target key start
LH: loop header
LB: loop body
LE: loop exit
PB: predicated region body
PF: predicated region fallthrough
CT: control target
= control target key end

     0   :  { %15 = vsyncpa [#allocation3], 0  ;;  %s824_s0 = inlined_call_operand.hbm [shape: f32[8,128], index: 0, kind: input, shape index: {}]   ;;  %s825_s1 = inlined_call_operand.vmem [shape: s32[2,1], index: 1, kind: input, shape index: {}]   ;;  %s826_s2 = inlined_call_operand.hbm [shape: bf16[128,128], index: 2, kind: input, shape index: {}]   ;;  %s827_s3 = inlined_call_operand.vmem [shape: f32[1,128], index: 3, kind: input, shape index: {}]   ;;  %s828_s4 = inlined_call_operand.hbm [shape: bf16[128,128], index: 4, kind: input, shape index: {}]   ;;  %s829_s5 = inlined_call_operand.vmem [shape: f32[1,128], index: 5, kind: input, shape index: {}]   ;;  %s830_s6 = inlined_call_operand.hbm [shape: bf16[128,128], index: 6, kind: input, shape index: {}]   ;;  %s831_s7 = inlined_call_operand.vmem [shape: f32[1,128], index: 7, kind: input, shape index: {}]   ;;  %s832_s8 = inlined_call_operand.hbm [shape: f32[8,128], index: 8, kind: output, shape index: {0}]   ;;  %s833_s9 = inlined_call_operand.hbm [shape: f32[2,128], index: 9, kind: output, shape index: {1}]  }
   0x1   :  { %16 = vsyncpa [#allocation6], 0 }
   0x2   :  { %17 = vsyncpa [#allocation9], 0 }
   0x3   :  { %18 = vsyncpa [#allocation4], 0  ;;  %s37_s11 = sshll.u32 %s826_s2, 4  ;;  %s38_s11 = int_to_ptr.hbm [resolvable:$true] %s37_s11 }
   0x4   :  { %19 = vsyncpa [#allocation12], 0  ;;  %s734_s12 = smov [#allocation5]   ;;  %s25_s16 = sshll.u32 %s824_s0, 4  ;;  %s26_s16 = int_to_ptr.hbm [resolvable:$true] %s25_s16 }
   0x5   :  { %s39_s13 = sshll.u32 %s734_s12, 4  ;;  %s735_s17 = smov 64   ;;  %s40_s13 = int_to_ptr.vmem [resolvable:$true] %s39_s13 }
   0x6   :  { %s736_s18 = smov 4   ;;  %s737_s19 = smov [#allocation2]  }
   0x7   :  { %45 = dma.hbm_to_vmem [thread:$0]  %s38_s11, 1024, %s40_s13, [#allocation6], %s735_s17, %s735_s17, %s736_s18  }
   0x8   :  { %s27_s20 = sshll.u32 %s737_s19, 4  ;;  %s52_s23 = sshll.u32 %s828_s4, 4  ;;  %s28_s20 = int_to_ptr.vmem [resolvable:$true] %s27_s20  ;;  %s53_s23 = int_to_ptr.hbm [resolvable:$true] %s52_s23 }
   0x9   :  { %30 = dma.hbm_to_vmem [thread:$0]  %s26_s16, 128, %s28_s20, [#allocation3]  }
   0xa   :  { %s67_s25 = sshll.u32 %s830_s6, 4  ;;  %s738_s26 = smov [#allocation7]   ;;  %s68_s25 = int_to_ptr.hbm [resolvable:$true] %s67_s25 }
   0xb   :  { %s54_s27 = sshll.u32 %s738_s26, 4  ;;  %s739_s0 = smov [#allocation8]   ;;  %s55_s27 = int_to_ptr.vmem [resolvable:$true] %s54_s27 }
   0xc   :  { %60 = dma.hbm_to_vmem [thread:$0]  %s53_s23, 1024, %s55_s27, [#allocation6], %s735_s17, %s735_s17, %s736_s18  }
   0xd   :  { %s69_s28 = sshll.u32 %s739_s0, 4  ;;  %s70_s28 = int_to_ptr.vmem [resolvable:$true] %s69_s28 }
   0xe   :  { %75 = dma.hbm_to_vmem [thread:$0]  %s68_s25, 1024, %s70_s28, [#allocation9], %s735_s17, %s735_s17, %s736_s18  }
   0xf   :  { %724 = dma.done.wait [#allocation3], 128  }
  0x10   :  { %725 = vsyncadd [#allocation3], 4294967168 }
  0x11   :  { %726 = dma.done.wait [#allocation6], 2048  }
  0x12   :  { %727 = vsyncadd [#allocation6], 4294965248 }
  0x13   :  { %728 = dma.done.wait [#allocation9], 1024  }
  0x14   :  { %729 = vsyncadd [#allocation9], 4294966272  ;;  %v547_v0 = vld [vmem:[#allocation5 + $0x38] sm:$0xff]  ;;  %v546_v1 = vld [vmem:[#allocation5 + $0x30] sm:$0xff]  ;;  %v740_v23 = vmov 0   ;;  %v262_v38 = vlaneseq  ;;  %v741_v54 = vmov 0.0  }
  0x15   :  { %164 = vmatpush.bf16.msra.mxu0 %v547_v0  ;;  %v555_v2 = vld [vmem:[#allocation7 + $0x38] sm:$0xff]  ;;  %v554_v3 = vld [vmem:[#allocation7 + $0x30] sm:$0xff]  ;;  %v545_v4 = vld [vmem:[#allocation5 + $0x28] sm:$0xff]  ;;  %574 = vset.pattern.permute.xlu0 %v740_v23  ;;  %vm278_vm9 = vcmask 64512   ;;  %s414_s13 = sshll.u32 %s832_s8, 4  ;;  %s743_s16 = smov [#allocation11]   ;;  %s415_s13 = int_to_ptr.hbm [resolvable:$true] %s414_s13 }
  0x16   :  { %247 = vmatpush.bf16.msra.mxu1 %v555_v2  ;;  %v553_v5 = vld [vmem:[#allocation7 + $0x28] sm:$0xff]  ;;  %v544_v6 = vld [vmem:[#allocation5 + $0x20] sm:$0xff]  ;;  %v543_v8 = vld [vmem:[#allocation5 + $0x18] sm:$0xff]  ;;  %v263_v41 = vshrl.u32 %v262_v38, 7  ;;  %v265_v43 = vand.u32 127, %v262_v38  ;;  %s423_s17 = sshll.u32 %s743_s16, 4  ;;  %s424_s17 = int_to_ptr.vmem [resolvable:$true] %s423_s17 }
  0x17   :  { %v552_v7 = vld [vmem:[#allocation7 + $0x20] sm:$0xff]  ;;  %v551_v9 = vld [vmem:[#allocation7 + $0x18] sm:$0xff]  ;;  %v542_v10 = vld [vmem:[#allocation5 + $0x10] sm:$0xff]  ;;  %s425_s20 = sshll.u32 %s833_s9, 4  ;;  %s426_s20 = int_to_ptr.hbm [resolvable:$true] %s425_s20 }
  0x18   :  { %v550_v11 = vld [vmem:[#allocation7 + $0x10] sm:$0xff]  ;;  %v541_v12 = vld [vmem:[#allocation5 + $0x8] sm:$0xff]  ;;  %v540_v13 = vld [vmem:[#allocation5] sm:$0xff]  ;;  %v266_v44 = vmul.u32 4, %v263_v41 }
  0x19   :  { %165 = vmatpush.bf16.msra.mxu0 %v546_v1  ;;  %v94_v14 = vld [vmem:[#allocation2] sm:$0xff]  ;;  %v549_v18 = vld [vmem:[#allocation7 + $0x8] sm:$0xff]  ;;  %v548_v20 = vld [vmem:[#allocation7] sm:$0xff] }
  0x1a   :  { %248 = vmatpush.bf16.msra.mxu1 %v554_v3  ;;  %v95_v15 = vpack.c.bf16 %v94_v14, %v94_v14  ;;  %v261_v16 = vld [vmem:[%s825_s1] sm:$0x3]  ;;  %v562_v40 = vld [vmem:[#allocation8 + $0x30] sm:$0xff]  ;;  %v561_v42 = vld [vmem:[#allocation8 + $0x28] sm:$0xff]  ;;  %v267_v46 = vsub.s32 %v265_v43, %v266_v44 }
  0x1b   :  { %v302_v17 = vcvt.s32.f32 %v261_v16  ;;  %272 = vperm.xlu0 %574, %v261_v16   ;;  %v575_v32 = vld [vmem:[%s827_s3] ss:$0 sm:$0xff]  ;;  %v560_v45 = vld [vmem:[#allocation8 + $0x20] sm:$0xff]  ;;  %v558_v49 = vld [vmem:[#allocation8 + $0x10] sm:$0xff] }
  0x1c   :  { %v563_v39 = vld [vmem:[#allocation8 + $0x38] sm:$0xff]  ;;  %vm268_vm4 = vcmp.ge.s32.totalorder %v267_v46, 0  ;;  %vm269_vm5 = vcmp.lt.s32.totalorder %v267_v46, 4  ;;  %v557_v51 = vld [vmem:[#allocation8 + $0x8] sm:$0xff]  ;;  %v556_v57 = vld [vmem:[#allocation8] sm:$0xff] }
  0x1d   :  { %166 = vmatpush.bf16.msra.mxu0 %v545_v4  ;;  %v303_v19 = vmax.f32 %v302_v17, 1.0  ;;  %393 = vmatpush.bf16.msra.mxu3 %v563_v39  ;;  %v559_v47 = vld [vmem:[#allocation8 + $0x18] sm:$0xff]  ;;  %vm270_vm6 = vmand %vm268_vm4, %vm269_vm5 }
  0x1e   :  { %249 = vmatpush.bf16.msra.mxu1 %v553_v5  ;;  %v576_v50 = vld [vmem:[%s829_s5] ss:$0 sm:$0xff]  ;;  %s742_s5 = smov [#allocation10]  }
  0x1f   :  { %578 = vrcp.f32 %v303_v19  ;;  %v315_v24 = vand.u32 2147483648, %v303_v19  ;;  %vm309_vm0 = vweird.f32 %v303_v19  ;;  %v313_v26 = vand.u32 2147483647, %v303_v19  ;;  %s412_s10 = sshll.u32 %s742_s5, 4  ;;  %v577_v62 = vld [vmem:[%s831_s7] ss:$0 sm:$0xff]  ;;  %s413_s10 = int_to_ptr.vmem [resolvable:$true] %s412_s10 }
  0x21   :  { %167 = vmatpush.bf16.msra.mxu0 %v544_v6  ;;  %v316_v28 = vor.u32 1.1754944e-38, %v315_v24  ;;  %vm314_vm3 = vcmp.eq.f32.partialorder %v313_v26, 8.507059e+37  ;;  %394 = vmatpush.bf16.msra.mxu3 %v562_v40 }
  0x22   :  { %250 = vmatpush.bf16.msra.mxu1 %v552_v7 }
  0x25   :  { %168 = vmatpush.bf16.msra.mxu0 %v543_v8  ;;  %v579_v21 = vpop.eup %578  ;;  %395 = vmatpush.bf16.msra.mxu3 %v561_v42 }
  0x26   :  { %251 = vmatpush.bf16.msra.mxu1 %v551_v9  ;;  %v305_v22 = vmul.f32 %v579_v21, %v303_v19  ;;  %vm310_vm1 = vweird.f32 %v579_v21 }
  0x27   :  { %vm311_vm2 = vmor %vm309_vm0, %vm310_vm1 }
  0x28   :  { %v306_v25 = vsub.f32 1.0, %v305_v22 }
  0x29   :  { %169 = vmatpush.bf16.msra.mxu0 %v542_v10  ;;  %396 = vmatpush.bf16.msra.mxu3 %v560_v45 }
  0x2a   :  { %252 = vmatpush.bf16.msra.mxu1 %v550_v11  ;;  %v307_v27 = vmul.f32 %v579_v21, %v306_v25 }
  0x2c   :  { %v308_v29 = vadd.f32 %v579_v21, %v307_v27 }
  0x2d   :  { %170 = vmatpush.bf16.msra.mxu0 %v541_v12  ;;  %397 = vmatpush.bf16.msra.mxu3 %v559_v47 }
  0x2e   :  { %253 = vmatpush.bf16.msra.mxu1 %v549_v18  ;;  %v312_v30 = vsel %vm311_vm2, %v579_v21, %v308_v29 }
  0x2f   :  { %v317_v31 = vsel %vm314_vm3, %v316_v28, %v312_v30 }
  0x30   :  { %320 = vperm.xlu0 %574, %v317_v31  }
  0x31   :  { %171 = vmatpush.bf16.msra.mxu0 %v540_v13  ;;  %398 = vmatpush.bf16.msra.mxu3 %v558_v49 }
  0x32   :  { %254 = vmatpush.bf16.msra.mxu1 %v548_v20 }
  0x34   :  { %172 = vmatmul.bf16.vlgmr.msra.gmra.mxu0 %v95_v15 }
  0x35   :  { %399 = vmatpush.bf16.msra.mxu3 %v557_v51 }
  0x39   :  { %400 = vmatpush.bf16.msra.mxu3 %v556_v57 }
  0x8d   :  { %v273_v48 = vpop.permute.xlu0 %272 }
  0x8e   :  { %vm274_vm7 = vcmp.lt.s32.totalorder %v267_v46, %v273_v48 }
  0x8f   :  { %vm275_vm8 = vmand %vm270_vm6, %vm274_vm7 }
  0x90   :  { %v506_v55 = vsel %vm275_vm8, 1.0, %v741_v54 }
  0xa2   :  { %v321_v58 = vpop.permute.xlu0 %320 }
  0xb1   :  { %v173_v33 = vpop.f32.mrf.mxu0 }
  0xb2   :  { %v174_v34 = vadd.f32 %v575_v32, %v173_v33 }
  0xb4   :  { %v177_v35 = vmax.f32 %v174_v34, 0.0 }
  0xb6   :  { %v178_v36 = vpack.c.bf16 %v177_v35, %v177_v35 }
  0xb8   :  { %255 = vmatmul.bf16.vlgmr.msra.gmra.mxu1 %v178_v36 }
  0xb9   :  { %v175_v37 = vpop.f32.mrf.mxu0 }
 0x135   :  { %v256_v52 = vpop.f32.mrf.mxu1 }
 0x136   :  { %v257_v53 = vadd.f32 %v576_v50, %v256_v52 }
 0x138   :  { %260 = vst [vmem:[#allocation10] sm:$0xff] %v257_v53  ;;  %297 = vmatpush.msra.mxu2 %v257_v53 }
 0x139   :  { %507 = vmatmul.msk.f32.vlgmr.msra.gmra.mxu2 %vm278_vm9, %v506_v55  ;;  %417 = dma.vmem_to_hbm [thread:$0]  %s413_s10, 128, %s415_s13, [#allocation4]  }
 0x13d   :  { %v258_v56 = vpop.f32.mrf.mxu1 }
 0x1bc   :  { %v299_v59 = vpop.f32.mrf.mxu2 }
 0x1bd   :  { %v323_v60 = vmul.f32 %v321_v58, %v299_v59 }
 0x1bf   :  { %v324_v61 = vpack.c.bf16 %v323_v60, %v323_v60 }
 0x1c1   :  { %401 = vmatmul.bf16.vlgmr.msra.gmra.mxu3 %v324_v61 }
 0x244   :  { %v402_v63 = vpop.f32.mrf.mxu3 }
 0x245   :  { %v403_v0 = vadd.f32 %v577_v62, %v402_v63 }
 0x247   :  { %406 = vst [vmem:[#allocation11] sm:$0x3] %v403_v0 }
 0x248   :  { %428 = dma.vmem_to_hbm [thread:$0]  %s424_s17, 32, %s426_s20, [#allocation12]  }
 0x24c   :  { %v404_v1 = vpop.f32.mrf.mxu3 }
 0x24d   :  { %730 = dma.done.wait [#allocation4], 128  }
 0x24e   :  { %731 = vsyncadd [#allocation4], 4294967168 }
 0x24f   :  { %732 = dma.done.wait [#allocation12], 32  }
 0x250   :  { %733 = vsyncadd [#allocation12], 4294967264 }
 0x251   :  { %437 = vsyncpa [#allocation3], 1 }
 0x252   :  { %438 = vsyncpa [#allocation6], 1 }
 0x253   :  { %439 = vsyncpa [#allocation9], 1 }
 0x254   :  { %440 = vsyncpa [#allocation4], 1 }
 0x255   :  { %441 = vsyncpa [#allocation12], 1 }

</bundles_post_ra>
